<compile_context>
chip_gen: v7x
topology: tpu7x:2x2x1
jax: 0.10.0
libtpu: 0.0.40
codegen_flags: <defaults>
</compile_context>

<pallas_src>
import functools
import math

import jax
import jax.numpy as jnp
from jax.experimental import pallas as pl
from jax.experimental.pallas import tpu as pltpu

_LANES = 128
_SUBLANES = 8
_ALIGN = _LANES * _SUBLANES  # 1024: minimal f32 (8,128) tile


def _fold_constants(quant_chan, rescale_factor):
    """Fold the PyTorch scalar math into 3 constants.

    out = round( copysign(log1p((mu/r)*|x|), x) * (0.5*mu/log1p(mu)) + (0.5*mu + 0.5) )
    """
    mu = quant_chan - 1.0
    return (
        mu / float(rescale_factor),          # scale_in
        0.5 * mu / math.log1p(mu),           # scale_out
        0.5 * mu + 0.5,                      # offset
    )


def _mu_encode_kernel(x_ref, o_ref, *, scale_in, scale_out, offset):
    x = x_ref[...].astype(jnp.float32)                   # free VPU cast if bf16/f16 input
    mag = jnp.log1p(jnp.float32(scale_in) * jnp.abs(x))  # one EUP log1p / element, mag >= 0
    # Sign-bit transfer (copysign) instead of jnp.sign(x) * mag: two VPU bit ops.
    sbit = pltpu.bitcast(x, jnp.uint32) & jnp.uint32(0x80000000)
    signed = pltpu.bitcast(pltpu.bitcast(mag, jnp.uint32) | sbit, jnp.float32)
    o_ref[...] = jnp.round(signed * jnp.float32(scale_out) + jnp.float32(offset))


def _mu_encode_jax(x, scale_in, scale_out, offset):
    """Pure-JAX path for tiny (<1024-element) ragged tails; same folded math."""
    x = x.astype(jnp.float32)
    mag = jnp.log1p(jnp.float32(scale_in) * jnp.abs(x))
    signed = jnp.where(x < 0, -mag, mag)
    return jnp.round(signed * jnp.float32(scale_out) + jnp.float32(offset))


def _pick_block_bytes():
    """Per-generation block size (bytes) + optional scoped-VMEM limit bump."""
    try:
        kind = jax.devices()[0].device_kind.lower()
    except Exception:  # pragma: no cover - no device visible at trace time
        kind = ""
    if "v7" in kind:
        # 3.2 TB/s HBM: keep the 0.35us/step overhead <10%. 4 bufs x 8 MiB = 32 MiB
        # hits the v7x scoped default (physical VMEM 64 MiB/TC), so raise the limit.
        return 8 << 20
    if "v6" in kind:
        return 6 << 20   # 24 MiB total, under the 32 MiB scoped default
    if "v5" in kind:
        return 3 << 20   # 12 MiB total, under v5e's 16 MiB scoped default
    return 2 << 20       # unknown / older chips: stay conservative


def _pick_lane_width(n_slab):
    """Widest last dim (multiple of 128) dividing n_slab with rows a multiple of 8."""
    for c in (4096, 2048, 1024, 512, 256, _LANES):
        if n_slab % c == 0 and (n_slab // c) % _SUBLANES == 0:
            return c
    return _LANES  # unreachable: n_slab % 1024 == 0 guarantees C=128 works


def _pick_tile_rows(rows, lane_width, block_bytes):
    """Largest multiple-of-8 tile, preferring an exact divisor of rows."""
    target_elems = max(_ALIGN, block_bytes // 4)
    target = (target_elems // lane_width) // _SUBLANES * _SUBLANES
    target = max(_SUBLANES, min(rows, target))
    if rows % target == 0:
        return target
    # Search downward for a divisor; only take it if it does not shrink the
    # block by more than 2x (otherwise one masked final block is cheaper).
    t = target
    while t >= _SUBLANES:
        if rows % t == 0:
            break
        t -= _SUBLANES
    return t if (t * 2 >= target) else target


def _mu_encode_aligned(flat, n_slab, consts, block_bytes):
    """Run the Pallas kernel on a 1024-aligned flat f32/bf16 slab of n_slab elems."""
    scale_in, scale_out, offset = consts
    lane_width = _pick_lane_width(n_slab)
    rows = n_slab // lane_width
    slab = flat.reshape(rows, lane_width)          # pure metadata reshape

    tile_rows = _pick_tile_rows(rows, lane_width, block_bytes)

    # Only raise the scoped-VMEM limit when the double-buffered working set
    # (2 in-bufs + 2 out-bufs) plus headroom would exceed the 32 MiB default
    # (i.e. v7x-sized blocks); cap well under v7x's 64 MiB/TC physical VMEM.
    vmem_need = 4 * tile_rows * lane_width * 4 + (8 << 20)
    vmem_limit = min(vmem_need, 48 << 20) if vmem_need > (32 << 20) else None

    kernel = functools.partial(
        _mu_encode_kernel, scale_in=scale_in, scale_out=scale_out, offset=offset
    )

    out_slab = pl.pallas_call(
        kernel,
        out_shape=jax.ShapeDtypeStruct((rows, lane_width), jnp.float32),
        grid_spec=pltpu.PrefetchScalarGridSpec(
            num_scalar_prefetch=0,
            grid=(pl.cdiv(rows, tile_rows),),
            in_specs=[pl.BlockSpec((tile_rows, lane_width), lambda i: (i, 0))],
            out_specs=pl.BlockSpec((tile_rows, lane_width), lambda i: (i, 0)),
        ),
        compiler_params=pltpu.CompilerParams(
            # "parallel" lets the grid shard across the 2 TensorCores on v7x and
            # is a no-op elsewhere.
            # TODO(synk): sweep pltpu.CORE_PARALLEL / an explicit 2-way core axis
            # on v7x if xprof shows the second core's DMA engines idle.
            dimension_semantics=("parallel",),
            vmem_limit_bytes=vmem_limit,
        ),
    )(slab)
    return out_slab.reshape(-1)


def mu_encode(x, quant_chan=256, rescale_factor=10, *, target_block_bytes=None):
    """Pallas TPU implementation of the mu_encode module's forward pass.

    Accepts any input shape / float dtype; returns float32 of the same shape.
    """
    orig_shape = x.shape
    n = x.size
    consts = _fold_constants(quant_chan, rescale_factor)
    if n == 0:
        return jnp.zeros(orig_shape, jnp.float32)

    block_bytes = target_block_bytes if target_block_bytes else _pick_block_bytes()
    flat = jnp.ravel(x)  # keep native dtype; the f32 cast happens in-kernel on the VPU

    n_main = (n // _ALIGN) * _ALIGN
    tail = n - n_main

    if tail == 0:
        # Aligned fast path: pure metadata reshape, no pad, no slice.
        out = _mu_encode_aligned(flat, n, consts, block_bytes)
        return out.reshape(orig_shape)

    if n_main == 0:
        # Tiny input (<1024 elems): not worth a kernel launch.
        return _mu_encode_jax(flat, *consts).reshape(orig_shape)

    # Ragged: kernel on the 1024-aligned prefix, pure JAX on the <1024-elem tail.
    # TODO(synk): a fully in-kernel masked final tile would also remove the
    # concatenate pass, but is not worth the complexity for this edge case.
    out_main = _mu_encode_aligned(flat[:n_main], n_main, consts, block_bytes)
    out_tail = _mu_encode_jax(flat[n_main:], *consts)
    return jnp.concatenate([out_main, out_tail]).reshape(orig_shape)


def _mu_encode_ref(x, quant_chan=256, rescale_factor=10):
    # Pure-JAX reference mirroring the PyTorch code op-for-op.
    x = x.astype(jnp.float32) / rescale_factor
    mu = quant_chan - 1.0
    x_mu = jnp.sign(x) * jnp.log1p(mu * jnp.abs(x)) / jnp.log1p(mu)
    return jnp.round((x_mu + 1.0) / 2.0 * mu + 0.5)


def _check(x):
    out = jax.block_until_ready(mu_encode(x, quant_chan=256, rescale_factor=10))
    ref = _mu_encode_ref(x, quant_chan=256, rescale_factor=10)
    assert out.shape == x.shape and out.dtype == jnp.float32
    diff = jnp.abs(out - ref)
    # Constant folding reorders float ops by a few ULPs; that can only flip a
    # round() result exactly at a k+0.5 boundary -> allow rare off-by-one codes.
    assert float(jnp.max(diff)) <= 1.0
    assert float(jnp.mean(diff > 0)) < 1e-3


if __name__ == "__main__":
    # Small NCHW-like input, consistent with an audio tensor (aligned kernel path).
    x = jax.random.uniform(
        jax.random.PRNGKey(0), (2, 4, 16, 16), dtype=jnp.float32, minval=-10.0, maxval=10.0
    )
    _check(x)

    # Tiny ragged input (<1024 elems): pure-JAX fallback path.
    x_ragged_small = jax.random.uniform(
        jax.random.PRNGKey(1), (3, 5, 7), dtype=jnp.float32, minval=-10.0, maxval=10.0
    )
    _check(x_ragged_small)

    # Ragged input >=1024 elems: aligned-prefix kernel + pure-JAX tail path.
    x_ragged_large = jax.random.uniform(
        jax.random.PRNGKey(2), (3, 11, 37), dtype=jnp.float32, minval=-10.0, maxval=10.0
    )
    _check(x_ragged_large)

    print("KERNEL_OK")
</pallas_src>

<mosaic_0001>
module attributes {stable_mosaic.version = 11 : i64} {
  func.func @_mu_encode_kernel(%arg0: i32, %arg1: memref<8x256xf32, #tpu.memory_space<vmem>>, %arg2: memref<8x256xf32, #tpu.memory_space<vmem>>) attributes {dimension_semantics = [#tpu.dimension_semantics<parallel>], iteration_bounds = array<i64: 1>, scalar_prefetch = 0 : i64, scratch_operands = 0 : i64, tpu.core_type = #tpu.core_type<tc>, window_params = [{transform_indices = @transform_0, window_bounds = array<i64: 8, 256>}, {transform_indices = @transform_1, window_bounds = array<i64: 8, 256>}]} {
    %c0 = arith.constant 0 : index
    %c0_0 = arith.constant 0 : index
    %0 = vector.load %arg1[%c0, %c0_0] : memref<8x256xf32, #tpu.memory_space<vmem>>, vector<8x256xf32>
    %1 = math.absf %0 : vector<8x256xf32>
    %cst = arith.constant 2.550000e+01 : f32
    %2 = vector.broadcast %cst : f32 to vector<8x256xf32>
    %3 = arith.mulf %2, %1 : vector<8x256xf32>
    %4 = math.log1p %3 : vector<8x256xf32>
    %5 = tpu.bitcast %0 : vector<8x256xf32> -> vector<8x256xi32>
    %c-2147483648_i32 = arith.constant -2147483648 : i32
    %6 = vector.broadcast %c-2147483648_i32 : i32 to vector<8x256xi32>
    %7 = arith.andi %5, %6 : vector<8x256xi32>
    %8 = tpu.bitcast %4 : vector<8x256xf32> -> vector<8x256xi32>
    %9 = arith.ori %8, %7 : vector<8x256xi32>
    %10 = tpu.bitcast %9 : vector<8x256xi32> -> vector<8x256xf32>
    %cst_1 = arith.constant 22.9929523 : f32
    %11 = vector.broadcast %cst_1 : f32 to vector<8x256xf32>
    %12 = arith.mulf %10, %11 : vector<8x256xf32>
    %cst_2 = arith.constant 1.280000e+02 : f32
    %13 = vector.broadcast %cst_2 : f32 to vector<8x256xf32>
    %14 = arith.addf %12, %13 : vector<8x256xf32>
    %15 = math.roundeven %14 : vector<8x256xf32>
    %c0_3 = arith.constant 0 : index
    %c0_4 = arith.constant 0 : index
    %16 = vector.load %arg2[%c0_3, %c0_4] : memref<8x256xf32, #tpu.memory_space<vmem>>, vector<8x256xf32>
    tpu.vector_store %arg2[%c0_3, %c0_4], %15 {strides = array<i32>} : memref<8x256xf32, #tpu.memory_space<vmem>>, vector<8x256xf32>,
    return
  }
  func.func @transform_0(%arg0: i32) -> (i32, i32) {
    %c0_i32 = arith.constant 0 : i32
    %c0_i32_0 = arith.constant 0 : i32
    return %arg0, %c0_i32 : i32, i32
  }
  func.func @transform_1(%arg0: i32) -> (i32, i32) {
    %c0_i32 = arith.constant 0 : i32
    %c0_i32_0 = arith.constant 0 : i32
    return %arg0, %c0_i32 : i32, i32
  }
}

</mosaic_0001>

<bundles_post_ra>
// kernel: tpu_custom_call.1
= control target key start
LH: loop header
LB: loop body
LE: loop exit
PB: predicated region body
PF: predicated region fallthrough
CT: control target
= control target key end

     0   :  { %6 = vsyncpa [#allocation3], 0  ;;  %s170_s0 = inlined_call_operand.hbm [shape: f32[8,256], index: 0, kind: input, shape index: {}]   ;;  %s171_s1 = inlined_call_operand.hbm [shape: f32[8,256], index: 1, kind: output, shape index: {}]  }
   0x1   :  { %7 = vsyncpa [#allocation4], 0  ;;  %s134_s6 = smov [#allocation2]   ;;  %s86_s10 = scalar_lea.hbm %s170_s0, 256 }
   0x2   :  { %s14_s7 = sshll.u32 %s134_s6, 4  ;;  %p87_p0 = scmp.ne.s32.totalorder %s170_s0, %s86_s10  ;;  %s15_s7 = int_to_ptr.vmem [resolvable:$true] %s14_s7 }
   0x3   :  { %p90_p1 = scmp.lt.u32.totalorder %s86_s10, %s170_s0 }
   0x5   :  { %p92_p2 = pnand %p90_p1, %p87_p0 }
   0x7   :  { %95 = shalt.err (!%p92_p2)
}
   0x8   :  { %s96_s15 = scalar_lea.vmem %s15_s7, 256  ;;  %p101_p4 = scmp.lt.s32.totalorder %s15_s7, %s15_s7 }
   0x9   :  { %p97_p3 = scmp.ne.s32.totalorder %s15_s7, %s96_s15  ;;  %p102_p5 = scmp.lt.s32.totalorder %s96_s15, %s96_s15 }
   0xb   :  { %p103_p6 = por %p102_p5, %p101_p4 }
   0xd   :  { %p104_p7 = pnand %p103_p6, %p97_p3 }
   0xf   :  { %107 = shalt.err (!%p104_p7)
}
  0x10   :  { %17 = dma.hbm_to_vmem [thread:$0]  %s170_s0, 256, %s15_s7, [#allocation3]  }
  0x11   :  { %130 = dma.done.wait [#allocation3], 256  }
  0x12   :  { %131 = vsyncadd [#allocation3], 4294967040  ;;  %v21_v0 = vld [vmem:[#allocation2] sm:$0xff]  ;;  %v22_v1 = vld [vmem:[#allocation2 + $0x8] sm:$0xff]  ;;  %s135_s0 = smov [#allocation5]  }
  0x13   :  { %v23_v2 = vand.u32 2147483647, %v21_v0  ;;  %v24_v3 = vand.u32 2147483647, %v22_v1  ;;  %v47_v16 = vand.u32 2147483648, %v21_v0  ;;  %v48_v20 = vand.u32 2147483648, %v22_v1 }
  0x14   :  { %s69_s18 = sshll.u32 %s135_s0, 4  ;;  %s70_s18 = int_to_ptr.vmem [resolvable:$true] %s69_s18 }
  0x15   :  { %v25_v4 = vmul.f32 25.5, %v23_v2  ;;  %v26_v5 = vmul.f32 25.5, %v24_v3  ;;  %s108_s19 = scalar_lea.vmem %s70_s18, 256  ;;  %p113_p9 = scmp.lt.s32.totalorder %s70_s18, %s70_s18 }
  0x16   :  { %p109_p8 = scmp.ne.s32.totalorder %s70_s18, %s108_s19  ;;  %p114_p10 = scmp.lt.s32.totalorder %s108_s19, %s108_s19 }
  0x17   :  { %v27_v6 = vadd.f32 1.0, %v25_v4  ;;  %v36_v7 = vadd.f32 1.0, %v26_v5  ;;  %v30_v8 = vmul.f32 -0.5, %v25_v4  ;;  %v39_v9 = vmul.f32 -0.5, %v26_v5 }
  0x18   :  { %v33_v11 = vand.u32 2147483647, %v25_v4  ;;  %v42_v13 = vand.u32 2147483647, %v26_v5  ;;  %p115_p11 = por %p114_p10, %p113_p9 }
  0x19   :  { %82 = vlog2.f32 %v27_v6  ;;  %v31_v10 = vadd.f32 1.0, %v30_v8  ;;  %v40_v12 = vadd.f32 1.0, %v39_v9 }
  0x1a   :  { %84 = vlog2.f32 %v36_v7  ;;  %vm34_vm0 = vcmp.lt.f32.partialorder %v33_v11, 0.0004427343  ;;  %vm43_vm1 = vcmp.lt.f32.partialorder %v42_v13, 0.0004427343  ;;  %p116_p12 = pnand %p115_p11, %p109_p8 }
  0x1b   :  { %v32_v14 = vmul.f32 %v31_v10, %v25_v4  ;;  %v41_v17 = vmul.f32 %v40_v12, %v26_v5 }
  0x23   :  { %v83_v15 = vpop.eup %82 }
  0x24   :  { %v85_v18 = vpop.eup %84  ;;  %v29_v19 = vmul.f32 0.6931472, %v83_v15 }
  0x25   :  { %v38_v21 = vmul.f32 0.6931472, %v85_v18 }
  0x26   :  { %v35_v22 = vsel %vm34_vm0, %v32_v14, %v29_v19 }
  0x27   :  { %v51_v23 = vor.u32 %v47_v16, %v35_v22  ;;  %v44_v24 = vsel %vm43_vm1, %v41_v17, %v38_v21 }
  0x28   :  { %v52_v25 = vor.u32 %v48_v20, %v44_v24 }
  0x29   :  { %v55_v26 = vmul.f32 22.992952, %v51_v23 }
  0x2a   :  { %v56_v27 = vmul.f32 22.992952, %v52_v25 }
  0x2b   :  { %v57_v28 = vadd.f32 128.0, %v55_v26 }
  0x2c   :  { %v58_v29 = vadd.f32 128.0, %v56_v27 }
  0x2d   :  { %v78_v30 = vround.rtne.f32 %v57_v28 }
  0x2e   :  { %v79_v31 = vround.rtne.f32 %v58_v29 }
  0x2f   :  { %61 = vst [vmem:[#allocation5] sm:$0xff] %v78_v30 }
  0x30   :  { %62 = vst [vmem:[#allocation5 + $0x8] sm:$0xff] %v79_v31 }
  0x31   :  { %119 = shalt.err (!%p116_p12)
}
  0x32   :  { %s120_s22 = scalar_lea.hbm %s171_s1, 256 }
  0x33   :  { %p121_p13 = scmp.ne.s32.totalorder %s171_s1, %s120_s22  ;;  %p124_p0 = scmp.lt.u32.totalorder %s120_s22, %s171_s1 }
  0x35   :  { %p126_p1 = pnand %p124_p0, %p121_p13 }
  0x37   :  { %129 = shalt.err (!%p126_p1)
}
  0x38   :  { %72 = dma.vmem_to_hbm [thread:$0]  %s70_s18, 256, %s171_s1, [#allocation4]  }
  0x39   :  { %132 = dma.done.wait [#allocation4], 256  }
  0x3a   :  { %133 = vsyncadd [#allocation4], 4294967040 }
  0x3b   :  { %76 = vsyncpa [#allocation3], 1 }
  0x3c   :  { %77 = vsyncpa [#allocation4], 1 }

</bundles_post_ra>
